<compile_context>
chip_gen: v7x
topology: tpu7x:2x2x1
jax: 0.10.0
libtpu: 0.0.40
codegen_flags: <defaults>
</compile_context>

<pallas_src>
import functools

import jax
import jax.numpy as jnp
from jax import lax
from jax.experimental import pallas as pl
from jax.experimental.pallas import tpu as pltpu

_NEG = -1.0e30
_SEXT = 128  # padded extended-target length (>= 2*S + 1), lane-friendly


# ---------------------------------------------------------------------------
# Generation-aware budgets
# ---------------------------------------------------------------------------
def _vmem_budget():
    """(per-grid-step input byte budget, scoped vmem_limit_bytes)."""
    try:
        cap = int(pltpu.get_tpu_info().vmem_capacity_bytes)
    except Exception:
        cap = 64 * 1024 * 1024                    # unknown -> assume smallest (v7x-class)
    if cap <= 80 * 1024 * 1024:                   # v7x: 64 MiB / TensorCore
        return 4 * 1024 * 1024, 48 * 1024 * 1024
    return 12 * 1024 * 1024, 96 * 1024 * 1024     # v5e / v6e: 128 MiB


# ---------------------------------------------------------------------------
# Kernel 1: CTC loss — log_softmax over vocab + forward DP (alpha recursion).
# Grid: "parallel" axis over batch blocks of <= 8 rows.
# ---------------------------------------------------------------------------
def _ctc_alpha_recursion(lp_ext_ref, skip_ref, tlen_ref, fmask_ref, out_ref):
    T, BB, SEXT = lp_ext_ref.shape
    iota_s = lax.broadcasted_iota(jnp.int32, (BB, SEXT), 1)
    skip = skip_ref[...]                                               # [BB,SEXT]
    tlen = tlen_ref[...]                                               # [BB,SEXT] i32
    # loop-invariant masks hoisted out of the recursion body
    m1 = iota_s >= 1
    m2 = (iota_s >= 2) & (skip > 0.0)

    # alpha_0: only s=0 (blank) and s=1 (first label) reachable (target_length >= 1).
    alpha0 = jnp.where(iota_s < 2, lp_ext_ref[0], _NEG)

    def body(t, alpha):
        lp_t = lp_ext_ref[t]                                           # [BB,SEXT]
        a1 = jnp.where(m1, pltpu.roll(alpha, 1, 1), _NEG)              # alpha[s-1]
        a2 = jnp.where(m2, pltpu.roll(alpha, 2, 1), _NEG)              # alpha[s-2]
        mx = jnp.maximum(alpha, jnp.maximum(a1, a2))
        lse = mx + jnp.log(jnp.exp(alpha - mx) + jnp.exp(a1 - mx) + jnp.exp(a2 - mx))
        return jnp.where(t < tlen, lse + lp_t, alpha)   # freeze once t >= t_length[b]

    alpha = lax.fori_loop(1, T, body, alpha0)

    # loss_b = -logsumexp(alpha[2L_b], alpha[2L_b - 1])
    masked = jnp.where(fmask_ref[...] > 0.0, alpha, _NEG)
    mx = jnp.max(masked, axis=-1, keepdims=True)
    ll = mx + jnp.log(jnp.sum(jnp.exp(masked - mx), axis=-1, keepdims=True))
    out_ref[...] = jnp.broadcast_to(-ll, (BB, SEXT))


def _log_softmax_last(x):
    m = jnp.max(x, axis=-1, keepdims=True)
    z = x - m
    return z - jnp.log(jnp.sum(jnp.exp(z), axis=-1, keepdims=True))


def _ctc_kernel_timemajor(logits_ref, ext_ref, skip_ref, tlen_ref, fmask_ref,
                          out_ref, lp_ext_ref):
    # logits_ref: [T, BB, V] (time-major, no wrapper transpose)
    T, BB, V = logits_ref.shape
    SEXT = skip_ref.shape[-1]

    lp = _log_softmax_last(logits_ref[...].astype(jnp.float32))        # [T,BB,V]
    lp_b = pltpu.einshape("tbv->btv", lp)                              # [BB,T,V] (VMEM-local)

    # one-hot of the blank-interleaved extended target, built in-kernel
    ext = ext_ref[...]                                                 # [BB,1,SEXT] i32
    iota_v = lax.broadcasted_iota(jnp.int32, (BB, V, SEXT), 1)
    oh = (ext == iota_v).astype(jnp.float32)                           # [BB,V,SEXT]

    # single batched MXU gather: lp_ext[b,t,s] = sum_v lp[b,t,v] * oh[b,v,s]
    lp_ext = lax.dot_general(lp_b, oh,
                             dimension_numbers=(((2,), (1,)), ((0,), (0,))),
                             preferred_element_type=jnp.float32)       # [BB,T,SEXT]
    lp_ext_ref[...] = pltpu.einshape("bts->tbs", lp_ext)               # [T,BB,SEXT]

    _ctc_alpha_recursion(lp_ext_ref, skip_ref, tlen_ref, fmask_ref, out_ref)


def _ctc_kernel_batchmajor(logits_ref, ext_ref, skip_ref, tlen_ref, fmask_ref,
                           out_ref, lp_ext_ref):
    # Fallback path: logits_ref [BB, T, V] (batch-major), per-row unrolled gather.
    BB, T, V = logits_ref.shape
    SEXT = skip_ref.shape[-1]

    lp = _log_softmax_last(logits_ref[...].astype(jnp.float32))        # [BB,T,V]
    ext = ext_ref[...]                                                 # [BB,1,SEXT]
    iota_v = lax.broadcasted_iota(jnp.int32, (V, SEXT), 0)
    for b in range(BB):                                                # static, BB <= 8
        oh_b = (ext[b] == iota_v).astype(jnp.float32)                  # [V,SEXT]
        lp_ext_b = jnp.dot(lp[b], oh_b,
                           preferred_element_type=jnp.float32)         # [T,SEXT]
        lp_ext_ref[:, pl.ds(b, 1), :] = lp_ext_b[:, None, :]

    _ctc_alpha_recursion(lp_ext_ref, skip_ref, tlen_ref, fmask_ref, out_ref)


def _ctc_pallas_call(kernel, logits, ext3, skip, tlen2d, fmask, *,
                     bb, time_major, vmem_limit):
    if time_major:
        T, Bp, V = logits.shape
        logits_spec = pl.BlockSpec((T, bb, V), lambda i: (0, i, 0))
    else:
        Bp, T, V = logits.shape
        logits_spec = pl.BlockSpec((bb, T, V), lambda i: (i, 0, 0))
    SEXT = skip.shape[1]
    nb = Bp // bb
    out = pl.pallas_call(
        kernel,
        out_shape=jax.ShapeDtypeStruct((Bp, SEXT), jnp.float32),
        grid=(nb,),
        in_specs=[
            logits_spec,
            pl.BlockSpec((bb, 1, SEXT), lambda i: (i, 0, 0)),
            pl.BlockSpec((bb, SEXT), lambda i: (i, 0)),
            pl.BlockSpec((bb, SEXT), lambda i: (i, 0)),
            pl.BlockSpec((bb, SEXT), lambda i: (i, 0)),
        ],
        out_specs=pl.BlockSpec((bb, SEXT), lambda i: (i, 0)),
        scratch_shapes=[pltpu.VMEM((T, bb, SEXT), jnp.float32)],
        compiler_params=pltpu.CompilerParams(
            dimension_semantics=("parallel",),
            vmem_limit_bytes=vmem_limit),
    )(logits, ext3, skip, tlen2d, fmask)
    return out[:, 0]


def _ctc_loss_per_sample(logits_tbv, ext3, skip, tlen2d, fmask, *, bb, vmem_limit):
    try:
        return _ctc_pallas_call(_ctc_kernel_timemajor, logits_tbv, ext3, skip,
                                tlen2d, fmask, bb=bb, time_major=True,
                                vmem_limit=vmem_limit)
    except Exception:
        # TODO(synk): fallback for toolchains where pltpu.einshape / batched
        # dot_general lowering is unavailable; pays one wrapper transpose instead.
        logits_btv = jnp.swapaxes(logits_tbv, 0, 1)
        return _ctc_pallas_call(_ctc_kernel_batchmajor, logits_btv, ext3, skip,
                                tlen2d, fmask, bb=bb, time_major=False,
                                vmem_limit=vmem_limit)


# ---------------------------------------------------------------------------
# Kernel 2 (fused): SimCC KL distillation + heatmap MSE, over a (B, T-tile) grid.
# Each grid cell writes one (1,1,1,128) partial-sum block (both axes "parallel");
# JAX sums the partials.  Reproduces F.kl_div defaults (reduction='mean' over ALL
# elements) and the reference's log_target=True on a (non-log) probability.
# ---------------------------------------------------------------------------
def _distill_kernel(*refs, tau, with_kl, with_mse, t_total, t_tile, ragged):
    refs = list(refs)
    idx = 0
    if with_kl:
        ox_ref, oy_ref, tx_ref, ty_ref = refs[idx:idx + 4]
        idx += 4
    if with_mse:
        hs_ref, ht_ref = refs[idx:idx + 2]
        idx += 2
    if with_kl:
        kl_out = refs[idx]
        idx += 1
    if with_mse:
        mse_out = refs[idx]
        idx += 1

    if ragged:
        t0 = pl.program_id(1) * t_tile
        tmask = (t0 + lax.broadcasted_iota(jnp.int32, (t_tile, 1, 1), 0)) < t_total

    if with_kl:
        inv_tau = 1.0 / tau

        def teacher_stats(x):
            # fused softmax + log_softmax of (x / tau): exp(z) reused for both.
            z = x * inv_tau
            z = z - jnp.max(z, axis=-1, keepdims=True)
            ez = jnp.exp(z)
            s = jnp.sum(ez, axis=-1, keepdims=True)
            lt = z - jnp.log(s)
            p = ez * pl.reciprocal(s, approx=True)
            return lt, p

        lqx = _log_softmax_last(ox_ref[...].astype(jnp.float32))
        lqy = _log_softmax_last(oy_ref[...].astype(jnp.float32))
        ltx, px = teacher_stats(tx_ref[...].astype(jnp.float32))
        lty, py = teacher_stats(ty_ref[...].astype(jnp.float32))
        # F.kl_div(lqx, px)                  -> px * (log px - lqx)
        # F.kl_div(lqy, py, log_target=True) -> exp(py) * (py - lqy)  (as in reference)
        term = px * (ltx - lqx) + jnp.exp(py) * (py - lqy)
        if ragged:
            term = jnp.where(tmask, term, 0.0)
        kl_out[...] = jnp.full(kl_out.shape, jnp.sum(term), jnp.float32)

    if with_mse:
        d = hs_ref[...].astype(jnp.float32) - ht_ref[...].astype(jnp.float32)
        sq = d * d
        if ragged:
            sq = jnp.where(tmask, sq, 0.0)
        mse_out[...] = jnp.full(mse_out.shape, jnp.sum(sq), jnp.float32)


def _distill_sums(student_x, student_y, teacher_x, teacher_y,
                  student_hm, teacher_hm, *, tau, with_kl, with_mse,
                  step_bytes, vmem_limit):
    assert with_kl or with_mse
    if with_kl:
        T, B, K, L = student_x.shape
    if with_mse:
        Tm, Bm, Kh, HW = student_hm.shape
        if not with_kl:
            T, B = Tm, Bm

    # Pick a T-tile from a generation-aware byte budget (no divisibility needed:
    # the ragged final tile is masked in-kernel).
    per_t_bytes = 0
    if with_kl:
        per_t_bytes += 2 * K * L * (student_x.dtype.itemsize + teacher_x.dtype.itemsize)
    if with_mse:
        per_t_bytes += Kh * HW * (student_hm.dtype.itemsize + teacher_hm.dtype.itemsize)
    TT = int(max(1, min(T, step_bytes // max(per_t_bytes, 1))))
    NT = (T + TT - 1) // TT
    ragged = (NT * TT != T)

    inputs, in_specs = [], []
    if with_kl:
        spec_student = pl.BlockSpec((TT, None, K, L), lambda b, t: (t, b, 0, 0))
        spec_teacher = pl.BlockSpec((None, TT, K, L), lambda b, t: (b, t, 0, 0))
        inputs += [student_x, student_y, teacher_x, teacher_y]
        in_specs += [spec_student, spec_student, spec_teacher, spec_teacher]
    if with_mse:
        spec_s_hm = pl.BlockSpec((TT, None, Kh, HW), lambda b, t: (t, b, 0, 0))
        spec_t_hm = pl.BlockSpec((None, TT, Kh, HW), lambda b, t: (b, t, 0, 0))
        inputs += [student_hm, teacher_hm]
        in_specs += [spec_s_hm, spec_t_hm]

    part_shape = jax.ShapeDtypeStruct((B, NT, 1, 128), jnp.float32)
    part_spec = pl.BlockSpec((1, 1, 1, 128), lambda b, t: (b, t, 0, 0))
    out_shapes, out_specs = [], []
    if with_kl:
        out_shapes.append(part_shape)
        out_specs.append(part_spec)
    if with_mse:
        out_shapes.append(part_shape)
        out_specs.append(part_spec)

    kern = functools.partial(_distill_kernel, tau=float(tau),
                             with_kl=with_kl, with_mse=with_mse,
                             t_total=T, t_tile=TT, ragged=ragged)
    outs = pl.pallas_call(
        kern,
        out_shape=tuple(out_shapes),
        grid=(B, NT),
        in_specs=in_specs,
        out_specs=tuple(out_specs),
        compiler_params=pltpu.CompilerParams(
            dimension_semantics=("parallel", "parallel"),
            vmem_limit_bytes=vmem_limit),
    )(*inputs)
    if not isinstance(outs, (tuple, list)):
        outs = (outs,)

    return [jnp.sum(o[:, :, 0, 0]) for o in outs]


# ---------------------------------------------------------------------------
# Forward pass of MultiTaskDistillLossV2
# ---------------------------------------------------------------------------
def multi_task_distill_loss_v2(
        out_logits, t_length, simcc_out_x, simcc_out_y, heatmap,
        target, target_length,
        teacher_simcc_x, teacher_simcc_y, teacher_heatmap,
        *, ctc_weight=1.0, dwpose_weight=1.0, vitpose_weight=1.0,
        dwpose_dist_temperature=8.0):
    T, B, V = out_logits.shape
    step_bytes, vmem_limit = _vmem_budget()
    loss = jnp.float32(0.0)

    if ctc_weight > 0.0:
        # CTC: log_softmax(out, -1) + CTCLoss(blank=0, reduction='none') then .mean()
        # Assumes target_length >= 1 for every sample (as the reference effectively does).
        S = target.shape[1]
        assert 2 * S + 1 <= _SEXT
        bb = min(B, 8)                              # <=8 rows/block; "parallel" over blocks
        pad_b = (-B) % bb
        tgt = target.astype(jnp.int32)
        tl = target_length.astype(jnp.int32)
        tln = t_length.astype(jnp.int32)
        logits = out_logits
        if pad_b:
            tgt = jnp.pad(tgt, ((0, pad_b), (0, 0)))
            tl = jnp.pad(tl, (0, pad_b))
            tln = jnp.pad(tln, (0, pad_b))
            logits = jnp.pad(out_logits, ((0, 0), (0, pad_b), (0, 0)))
        Bp = B + pad_b

        s_idx = jnp.arange(_SEXT)
        is_odd = (s_idx % 2) == 1
        lab_pos_raw = (s_idx - 1) // 2
        lab_pos = jnp.clip(lab_pos_raw, 0, S - 1)
        ext_len = 2 * tl + 1                                              # [Bp]
        valid = s_idx[None, :] < ext_len[:, None]                         # [Bp,SEXT]
        lab = tgt[:, lab_pos]                                             # [Bp,SEXT]
        ext = jnp.where(valid & is_odd[None, :], lab, 0).astype(jnp.int32)
        prev_lab = tgt[:, jnp.clip(lab_pos - 1, 0, S - 1)]
        skip = (is_odd[None, :] & (lab_pos_raw >= 1)[None, :]
                & (lab != prev_lab) & valid).astype(jnp.float32)
        fmask = ((s_idx[None, :] == 2 * tl[:, None])
                 | (s_idx[None, :] == 2 * tl[:, None] - 1)).astype(jnp.float32)
        tlen2d = jnp.broadcast_to(tln[:, None], (Bp, _SEXT))
        per_sample = _ctc_loss_per_sample(logits, ext[:, None, :], skip, tlen2d,
                                          fmask, bb=bb, vmem_limit=vmem_limit)
        loss = loss + ctc_weight * jnp.mean(per_sample[:B])

    with_kl = dwpose_weight > 0.0
    with_mse = vitpose_weight > 0.0
    if with_kl or with_mse:
        sx = sy = tch_x = tch_y = hs = ht = None
        if with_kl:
            # TODO(synk): DWPose teacher + input resize replaced by precomputed logits.
            Tt, Bb, K, L = simcc_out_x.shape
            sx, sy = simcc_out_x, simcc_out_y                              # time-major, no copy
            tch_x = teacher_simcc_x.reshape(Bb, Tt, K, L)                  # free ((b t)-major)
            tch_y = teacher_simcc_y.reshape(Bb, Tt, K, L)
        if with_mse:
            # TODO(synk): ViTPose teacher replaced by precomputed teacher heatmaps.
            Th, Bh, Kh, H, W = heatmap.shape
            hs = heatmap.reshape(Th, Bh, Kh, H * W)                        # free, lane-dense
            ht = teacher_heatmap.reshape(Bh, Th, Kh, H * W)                # free ((b t)-major)

        sums = _distill_sums(sx, sy, tch_x, tch_y, hs, ht,
                             tau=dwpose_dist_temperature,
                             with_kl=with_kl, with_mse=with_mse,
                             step_bytes=step_bytes, vmem_limit=vmem_limit)
        i = 0
        if with_kl:
            Tt, Bb, K, L = simcc_out_x.shape
            loss = loss + dwpose_weight * (sums[i] / float(Bb * Tt * K * L))
            i += 1
        if with_mse:
            Th, Bh, Kh, H, W = heatmap.shape
            loss = loss + vitpose_weight * (sums[i] / float(Bh * Th * Kh * H * W))
            i += 1

    return loss


if __name__ == "__main__":
    B, T, V, S = 2, 8, 32, 5
    K, H, W, L = 8, 16, 16, 128

    key = jax.random.PRNGKey(0)
    ks = jax.random.split(key, 8)

    out_logits = jax.random.normal(ks[0], (T, B, V), jnp.float32)
    t_length = jnp.array([T, T - 2], jnp.int32)
    # deterministic targets with no adjacent repeats (keeps CTC alignment feasible)
    target = ((jnp.arange(S)[None, :] * 3 + jnp.arange(B)[:, None] * 7) % (V - 1) + 1
              ).astype(jnp.int32)
    target_length = jnp.array([S, 3], jnp.int32)

    simcc_out_x = jax.random.normal(ks[1], (T, B, K, L), jnp.float32)
    simcc_out_y = jax.random.normal(ks[2], (T, B, K, L), jnp.float32)
    heatmap = jax.random.normal(ks[3], (T, B, K, H, W), jnp.float32)

    teacher_simcc_x = jax.random.normal(ks[4], (B * T, K, L), jnp.float32)
    teacher_simcc_y = jax.random.normal(ks[5], (B * T, K, L), jnp.float32)
    teacher_heatmap = jax.random.normal(ks[6], (B * T, K, H, W), jnp.float32)

    loss = multi_task_distill_loss_v2(
        out_logits, t_length, simcc_out_x, simcc_out_y, heatmap,
        target, target_length,
        teacher_simcc_x, teacher_simcc_y, teacher_heatmap,
        ctc_weight=1.0, dwpose_weight=1.0, vitpose_weight=1.0,
        dwpose_dist_temperature=8.0)
    loss = jax.block_until_ready(loss)
    assert bool(jnp.isfinite(loss))
    print("KERNEL_OK")
</pallas_src>

<mosaic_0001>
module attributes {stable_mosaic.version = 11 : i64} {
  func.func @_ctc_kernel_timemajor(%arg0: i32, %arg1: memref<8x2x32xf32, #tpu.memory_space<vmem>>, %arg2: memref<2x1x128xi32, #tpu.memory_space<vmem>>, %arg3: memref<2x128xf32, #tpu.memory_space<vmem>>, %arg4: memref<2x128xi32, #tpu.memory_space<vmem>>, %arg5: memref<2x128xf32, #tpu.memory_space<vmem>>, %arg6: memref<2x128xf32, #tpu.memory_space<vmem>>, %arg7: memref<8x2x128xf32, #tpu.memory_space<vmem>>) attributes {dimension_semantics = [#tpu.dimension_semantics<parallel>], iteration_bounds = array<i64: 1>, scalar_prefetch = 0 : i64, scratch_operands = 1 : i64, tpu.core_type = #tpu.core_type<tc>, window_params = [{transform_indices = @transform_0, window_bounds = array<i64: 8, 2, 32>}, {transform_indices = @transform_1, window_bounds = array<i64: 2, 1, 128>}, {transform_indices = @transform_2, window_bounds = array<i64: 2, 128>}, {transform_indices = @transform_3, window_bounds = array<i64: 2, 128>}, {transform_indices = @transform_4, window_bounds = array<i64: 2, 128>}, {transform_indices = @transform_5, window_bounds = array<i64: 2, 128>}]} {
    %c0 = arith.constant 0 : index
    %c0_0 = arith.constant 0 : index
    %c0_1 = arith.constant 0 : index
    %0 = vector.load %arg1[%c0, %c0_0, %c0_1] : memref<8x2x32xf32, #tpu.memory_space<vmem>>, vector<8x2x32xf32>
    %cst = arith.constant dense<0xFF800000> : vector<8x2xf32>
    %1 = vector.multi_reduction <maximumf>, %0, %cst [2] : vector<8x2x32xf32> to vector<8x2xf32>
    %2 = vector.shape_cast %1 : vector<8x2xf32> to vector<8x2x1xf32>
    %3 = vector.broadcast %2 : vector<8x2x1xf32> to vector<8x2x32xf32>
    %4 = arith.subf %0, %3 : vector<8x2x32xf32>
    %5 = math.exp %4 : vector<8x2x32xf32>
    %cst_2 = arith.constant dense<0.000000e+00> : vector<8x2xf32>
    %6 = vector.multi_reduction <add>, %5, %cst_2 [2] : vector<8x2x32xf32> to vector<8x2xf32>
    %7 = vector.shape_cast %6 : vector<8x2xf32> to vector<8x2x1xf32>
    %8 = math.log %7 : vector<8x2x1xf32>
    %9 = vector.broadcast %8 : vector<8x2x1xf32> to vector<8x2x32xf32>
    %10 = arith.subf %4, %9 : vector<8x2x32xf32>
    %11 = tpu.transpose %10, [1, 0, 2] : vector<8x2x32xf32> -> vector<2x8x32xf32>
    %c0_3 = arith.constant 0 : index
    %c0_4 = arith.constant 0 : index
    %c0_5 = arith.constant 0 : index
    %12 = vector.load %arg2[%c0_3, %c0_4, %c0_5] : memref<2x1x128xi32, #tpu.memory_space<vmem>>, vector<2x1x128xi32>
    %13 = tpu.iota {dimensions = array<i32: 1>} : vector<2x32x128xi32>
    %14 = vector.broadcast %12 : vector<2x1x128xi32> to vector<2x32x128xi32>
    %15 = arith.cmpi eq, %14, %13 : vector<2x32x128xi32>
    %16 = arith.extui %15 : vector<2x32x128xi1> to vector<2x32x128xi32>
    %17 = arith.sitofp %16 : vector<2x32x128xi32> to vector<2x32x128xf32>
    %cst_6 = arith.constant dense<0.000000e+00> : vector<2x8x128xf32>
    %18 = tpu.matmul %11, %17, %cst_6 {dimension_numbers = #tpu.dot_dimension_numbers<[2], [1], [1], [2], [0, 0, 0, 1, 1, 2], [0], [0]>} : vector<2x8x32xf32>, vector<2x32x128xf32>, vector<2x8x128xf32> -> vector<2x8x128xf32>
    %19 = tpu.transpose %18, [1, 0, 2] : vector<2x8x128xf32> -> vector<8x2x128xf32>
    %c0_7 = arith.constant 0 : index
    %c0_8 = arith.constant 0 : index
    %c0_9 = arith.constant 0 : index
    %20 = vector.load %arg7[%c0_7, %c0_8, %c0_9] : memref<8x2x128xf32, #tpu.memory_space<vmem>>, vector<8x2x128xf32>
    tpu.vector_store %arg7[%c0_7, %c0_8, %c0_9], %19 {strides = array<i32>} : memref<8x2x128xf32, #tpu.memory_space<vmem>>, vector<8x2x128xf32>,
    %21 = tpu.iota {dimensions = array<i32: 1>} : vector<2x128xi32>
    %c0_10 = arith.constant 0 : index
    %c0_11 = arith.constant 0 : index
    %22 = vector.load %arg3[%c0_10, %c0_11] : memref<2x128xf32, #tpu.memory_space<vmem>>, vector<2x128xf32>
    %c0_12 = arith.constant 0 : index
    %c0_13 = arith.constant 0 : index
    %23 = vector.load %arg4[%c0_12, %c0_13] : memref<2x128xi32, #tpu.memory_space<vmem>>, vector<2x128xi32>
    %c1_i32 = arith.constant 1 : i32
    %24 = vector.broadcast %c1_i32 : i32 to vector<2x128xi32>
    %25 = arith.cmpi sge, %21, %24 : vector<2x128xi32>
    %c2_i32 = arith.constant 2 : i32
    %26 = vector.broadcast %c2_i32 : i32 to vector<2x128xi32>
    %27 = arith.cmpi sge, %21, %26 : vector<2x128xi32>
    %cst_14 = arith.constant 0.000000e+00 : f32
    %28 = vector.broadcast %cst_14 : f32 to vector<2x128xf32>
    %29 = arith.cmpf ogt, %22, %28 : vector<2x128xf32>
    %30 = arith.andi %27, %29 : vector<2x128xi1>
    %c2_i32_15 = arith.constant 2 : i32
    %31 = vector.broadcast %c2_i32_15 : i32 to vector<2x128xi32>
    %32 = arith.cmpi slt, %21, %31 : vector<2x128xi32>
    %c0_16 = arith.constant 0 : index
    %c0_17 = arith.constant 0 : index
    %c0_18 = arith.constant 0 : index
    %33 = vector.load %arg7[%c0_16, %c0_17, %c0_18] : memref<8x2x128xf32, #tpu.memory_space<vmem>>, vector<1x2x128xf32>
    %34 = vector.shape_cast %33 : vector<1x2x128xf32> to vector<2x128xf32>
    %cst_19 = arith.constant -1.000000e+30 : f32
    %35 = vector.broadcast %cst_19 : f32 to vector<2x128xf32>
    %36 = arith.select %32, %34, %35 : vector<2x128xi1>, vector<2x128xf32>
    %c1_i32_20 = arith.constant 1 : i32
    %c7_i32 = arith.constant 7 : i32
    %37 = arith.addi %c1_i32_20, %c7_i32 : i32
    %c1_i32_21 = arith.constant 1 : i32
    %38 = scf.for %arg8 = %c1_i32_20 to %37 step %c1_i32_21 iter_args(%arg9 = %36) -> (vector<2x128xf32>)  : i32 {
      %58 = arith.index_cast %arg8 : i32 to index
      %c0_32 = arith.constant 0 : index
      %c0_33 = arith.constant 0 : index
      %59 = vector.load %arg7[%58, %c0_32, %c0_33] : memref<8x2x128xf32, #tpu.memory_space<vmem>>, vector<1x2x128xf32>
      %60 = vector.shape_cast %59 : vector<1x2x128xf32> to vector<2x128xf32>
      %c1_i32_34 = arith.constant 1 : i32
      %61 = tpu.dynamic_rotate %arg9 by %c1_i32_34 dim 1 : vector<2x128xf32>, i32 -> vector<2x128xf32>
      %cst_35 = arith.constant -1.000000e+30 : f32
      %62 = vector.broadcast %cst_35 : f32 to vector<2x128xf32>
      %63 = arith.select %25, %61, %62 : vector<2x128xi1>, vector<2x128xf32>
      %c2_i32_36 = arith.constant 2 : i32
      %64 = tpu.dynamic_rotate %arg9 by %c2_i32_36 dim 1 : vector<2x128xf32>, i32 -> vector<2x128xf32>
      %cst_37 = arith.constant -1.000000e+30 : f32
      %65 = vector.broadcast %cst_37 : f32 to vector<2x128xf32>
      %66 = arith.select %30, %64, %65 : vector<2x128xi1>, vector<2x128xf32>
      %67 = arith.maximumf %63, %66 : vector<2x128xf32>
      %68 = arith.maximumf %arg9, %67 : vector<2x128xf32>
      %69 = arith.subf %arg9, %68 : vector<2x128xf32>
      %70 = math.exp %69 : vector<2x128xf32>
      %71 = arith.subf %63, %68 : vector<2x128xf32>
      %72 = math.exp %71 : vector<2x128xf32>
      %73 = arith.addf %70, %72 : vector<2x128xf32>
      %74 = arith.subf %66, %68 : vector<2x128xf32>
      %75 = math.exp %74 : vector<2x128xf32>
      %76 = arith.addf %73, %75 : vector<2x128xf32>
      %77 = math.log %76 : vector<2x128xf32>
      %78 = arith.addf %68, %77 : vector<2x128xf32>
      %79 = vector.broadcast %arg8 : i32 to vector<2x128xi32>
      %80 = arith.cmpi slt, %79, %23 : vector<2x128xi32>
      %81 = arith.addf %78, %60 : vector<2x128xf32>
      %82 = arith.select %80, %81, %arg9 : vector<2x128xi1>, vector<2x128xf32>
      scf.yield %82 : vector<2x128xf32>
    }
    %c7_i32_22 = arith.constant 7 : i32
    %c0_23 = arith.constant 0 : index
    %c0_24 = arith.constant 0 : index
    %39 = vector.load %arg5[%c0_23, %c0_24] : memref<2x128xf32, #tpu.memory_space<vmem>>, vector<2x128xf32>
    %cst_25 = arith.constant 0.000000e+00 : f32
    %40 = vector.broadcast %cst_25 : f32 to vector<2x128xf32>
    %41 = arith.cmpf ogt, %39, %40 : vector<2x128xf32>
    %cst_26 = arith.constant -1.000000e+30 : f32
    %42 = vector.broadcast %cst_26 : f32 to vector<2x128xf32>
    %43 = arith.select %41, %38, %42 : vector<2x128xi1>, vector<2x128xf32>
    %cst_27 = arith.constant dense<0xFF800000> : vector<2xf32>
    %44 = vector.multi_reduction <maximumf>, %43, %cst_27 [1] : vector<2x128xf32> to vector<2xf32>
    %45 = vector.shape_cast %44 : vector<2xf32> to vector<2x1xf32>
    %46 = vector.broadcast %45 : vector<2x1xf32> to vector<2x128xf32>
    %47 = arith.subf %43, %46 : vector<2x128xf32>
    %48 = math.exp %47 : vector<2x128xf32>
    %cst_28 = arith.constant dense<0.000000e+00> : vector<2xf32>
    %49 = vector.multi_reduction <add>, %48, %cst_28 [1] : vector<2x128xf32> to vector<2xf32>
    %50 = vector.shape_cast %49 : vector<2xf32> to vector<2x1xf32>
    %51 = math.log %50 : vector<2x1xf32>
    %52 = arith.addf %45, %51 : vector<2x1xf32>
    %cst_29 = arith.constant 0.000000e+00 : f32
    %53 = vector.broadcast %cst_29 : f32 to vector<2x1xf32>
    %54 = arith.subf %53, %52 : vector<2x1xf32>
    %55 = vector.shape_cast %54 : vector<2x1xf32> to vector<2x1xf32>
    %56 = vector.broadcast %55 : vector<2x1xf32> to vector<2x128xf32>
    %c0_30 = arith.constant 0 : index
    %c0_31 = arith.constant 0 : index
    %57 = vector.load %arg6[%c0_30, %c0_31] : memref<2x128xf32, #tpu.memory_space<vmem>>, vector<2x128xf32>
    tpu.vector_store %arg6[%c0_30, %c0_31], %56 {strides = array<i32>} : memref<2x128xf32, #tpu.memory_space<vmem>>, vector<2x128xf32>,
    return
  }
  func.func @transform_0(%arg0: i32) -> (i32, i32, i32) {
    %c0_i32 = arith.constant 0 : i32
    %c0_i32_0 = arith.constant 0 : i32
    %c0_i32_1 = arith.constant 0 : i32
    return %c0_i32, %arg0, %c0_i32_0 : i32, i32, i32
  }
  func.func @transform_1(%arg0: i32) -> (i32, i32, i32) {
    %c0_i32 = arith.constant 0 : i32
    %c0_i32_0 = arith.constant 0 : i32
    %c0_i32_1 = arith.constant 0 : i32
    return %arg0, %c0_i32, %c0_i32_0 : i32, i32, i32
  }
  func.func @transform_2(%arg0: i32) -> (i32, i32) {
    %c0_i32 = arith.constant 0 : i32
    %c0_i32_0 = arith.constant 0 : i32
    return %arg0, %c0_i32 : i32, i32
  }
  func.func @transform_3(%arg0: i32) -> (i32, i32) {
    %c0_i32 = arith.constant 0 : i32
    %c0_i32_0 = arith.constant 0 : i32
    return %arg0, %c0_i32 : i32, i32
  }
  func.func @transform_4(%arg0: i32) -> (i32, i32) {
    %c0_i32 = arith.constant 0 : i32
    %c0_i32_0 = arith.constant 0 : i32
    return %arg0, %c0_i32 : i32, i32
  }
  func.func @transform_5(%arg0: i32) -> (i32, i32) {
    %c0_i32 = arith.constant 0 : i32
    %c0_i32_0 = arith.constant 0 : i32
    return %arg0, %c0_i32 : i32, i32
  }
}

module attributes {stable_mosaic.version = 11 : i64} {
  func.func @_ctc_kernel_batchmajor(%arg0: i32, %arg1: memref<2x8x32xf32, #tpu.memory_space<vmem>>, %arg2: memref<2x1x128xi32, #tpu.memory_space<vmem>>, %arg3: memref<2x128xf32, #tpu.memory_space<vmem>>, %arg4: memref<2x128xi32, #tpu.memory_space<vmem>>, %arg5: memref<2x128xf32, #tpu.memory_space<vmem>>, %arg6: memref<2x128xf32, #tpu.memory_space<vmem>>, %arg7: memref<8x2x128xf32, #tpu.memory_space<vmem>>) attributes {dimension_semantics = [#tpu.dimension_semantics<parallel>], iteration_bounds = array<i64: 1>, scalar_prefetch = 0 : i64, scratch_operands = 1 : i64, tpu.core_type = #tpu.core_type<tc>, window_params = [{transform_indices = @transform_0, window_bounds = array<i64: 2, 8, 32>}, {transform_indices = @transform_1, window_bounds = array<i64: 2, 1, 128>}, {transform_indices = @transform_2, window_bounds = array<i64: 2, 128>}, {transform_indices = @transform_3, window_bounds = array<i64: 2, 128>}, {transform_indices = @transform_4, window_bounds = array<i64: 2, 128>}, {transform_indices = @transform_5, window_bounds = array<i64: 2, 128>}]} {
    %c0 = arith.constant 0 : index
    %c0_0 = arith.constant 0 : index
    %c0_1 = arith.constant 0 : index
    %0 = vector.load %arg1[%c0, %c0_0, %c0_1] : memref<2x8x32xf32, #tpu.memory_space<vmem>>, vector<2x8x32xf32>
    %cst = arith.constant dense<0xFF800000> : vector<2x8xf32>
    %1 = vector.multi_reduction <maximumf>, %0, %cst [2] : vector<2x8x32xf32> to vector<2x8xf32>
    %2 = vector.shape_cast %1 : vector<2x8xf32> to vector<2x8x1xf32>
    %3 = vector.broadcast %2 : vector<2x8x1xf32> to vector<2x8x32xf32>
    %4 = arith.subf %0, %3 : vector<2x8x32xf32>
    %5 = math.exp %4 : vector<2x8x32xf32>
    %cst_2 = arith.constant dense<0.000000e+00> : vector<2x8xf32>
    %6 = vector.multi_reduction <add>, %5, %cst_2 [2] : vector<2x8x32xf32> to vector<2x8xf32>
    %7 = vector.shape_cast %6 : vector<2x8xf32> to vector<2x8x1xf32>
    %8 = math.log %7 : vector<2x8x1xf32>
    %9 = vector.broadcast %8 : vector<2x8x1xf32> to vector<2x8x32xf32>
    %10 = arith.subf %4, %9 : vector<2x8x32xf32>
    %c0_3 = arith.constant 0 : index
    %c0_4 = arith.constant 0 : index
    %c0_5 = arith.constant 0 : index
    %11 = vector.load %arg2[%c0_3, %c0_4, %c0_5] : memref<2x1x128xi32, #tpu.memory_space<vmem>>, vector<2x1x128xi32>
    %12 = tpu.iota {dimensions = array<i32: 0>} : vector<32x128xi32>
    %13 = vector.extract_strided_slice %11 {offsets = [0, 0, 0], sizes = [1, 1, 128], strides = [1, 1, 1]} : vector<2x1x128xi32> to vector<1x1x128xi32>
    %14 = vector.shape_cast %13 : vector<1x1x128xi32> to vector<1x128xi32>
    %15 = vector.broadcast %14 : vector<1x128xi32> to vector<32x128xi32>
    %16 = arith.cmpi eq, %15, %12 : vector<32x128xi32>
    %17 = arith.extui %16 : vector<32x128xi1> to vector<32x128xi32>
    %18 = arith.sitofp %17 : vector<32x128xi32> to vector<32x128xf32>
    %19 = vector.extract_strided_slice %10 {offsets = [0, 0, 0], sizes = [1, 8, 32], strides = [1, 1, 1]} : vector<2x8x32xf32> to vector<1x8x32xf32>
    %20 = vector.shape_cast %19 : vector<1x8x32xf32> to vector<8x32xf32>
    %cst_6 = arith.constant dense<0.000000e+00> : vector<8x128xf32>
    %21 = tpu.matmul %20, %18, %cst_6 {dimension_numbers = #tpu.dot_dimension_numbers<[1], [0], [0], [1], [0, 0, 1, 1], [], []>} : vector<8x32xf32>, vector<32x128xf32>, vector<8x128xf32> -> vector<8x128xf32>
    %22 = vector.shape_cast %21 : vector<8x128xf32> to vector<8x1x128xf32>
    %c0_7 = arith.constant 0 : index
    %c0_8 = arith.constant 0 : index
    %c0_9 = arith.constant 0 : index
    %23 = vector.load %arg7[%c0_7, %c0_8, %c0_9] : memref<8x2x128xf32, #tpu.memory_space<vmem>>, vector<8x1x128xf32>
    tpu.vector_store %arg7[%c0_7, %c0_8, %c0_9], %22 {strides = array<i32>} : memref<8x2x128xf32, #tpu.memory_space<vmem>>, vector<8x1x128xf32>,
    %24 = vector.extract_strided_slice %11 {offsets = [1, 0, 0], sizes = [1, 1, 128], strides = [1, 1, 1]} : vector<2x1x128xi32> to vector<1x1x128xi32>
    %25 = vector.shape_cast %24 : vector<1x1x128xi32> to vector<1x128xi32>
    %26 = vector.broadcast %25 : vector<1x128xi32> to vector<32x128xi32>
    %27 = arith.cmpi eq, %26, %12 : vector<32x128xi32>
    %28 = arith.extui %27 : vector<32x128xi1> to vector<32x128xi32>
    %29 = arith.sitofp %28 : vector<32x128xi32> to vector<32x128xf32>
    %30 = vector.extract_strided_slice %10 {offsets = [1, 0, 0], sizes = [1, 8, 32], strides = [1, 1, 1]} : vector<2x8x32xf32> to vector<1x8x32xf32>
    %31 = vector.shape_cast %30 : vector<1x8x32xf32> to vector<8x32xf32>
    %cst_10 = arith.constant dense<0.000000e+00> : vector<8x128xf32>
    %32 = tpu.matmul %31, %29, %cst_10 {dimension_numbers = #tpu.dot_dimension_numbers<[1], [0], [0], [1], [0, 0, 1, 1], [], []>} : vector<8x32xf32>, vector<32x128xf32>, vector<8x128xf32> -> vector<8x128xf32>
    %33 = vector.shape_cast %32 : vector<8x128xf32> to vector<8x1x128xf32>
    %c0_11 = arith.constant 0 : index
    %c1 = arith.constant 1 : index
    %c0_12 = arith.constant 0 : index
    %34 = vector.load %arg7[%c0_11, %c1, %c0_12] : memref<8x2x128xf32, #tpu.memory_space<vmem>>, vector<8x1x128xf32>
    tpu.vector_store %arg7[%c0_11, %c1, %c0_12], %33 {strides = array<i32>} : memref<8x2x128xf32, #tpu.memory_space<vmem>>, vector<8x1x128xf32>,
    %35 = tpu.iota {dimensions = array<i32: 1>} : vector<2x128xi32>
    %c0_13 = arith.constant 0 : index
    %c0_14 = arith.constant 0 : index
    %36 = vector.load %arg3[%c0_13, %c0_14] : memref<2x128xf32, #tpu.memory_space<vmem>>, vector<2x128xf32>
    %c0_15 = arith.constant 0 : index
    %c0_16 = arith.constant 0 : index
    %37 = vector.load %arg4[%c0_15, %c0_16] : memref<2x128xi32, #tpu.memory_space<vmem>>, vector<2x128xi32>
    %c1_i32 = arith.constant 1 : i32
    %38 = vector.broadcast %c1_i32 : i32 to vector<2x128xi32>
    %39 = arith.cmpi sge, %35, %38 : vector<2x128xi32>
    %c2_i32 = arith.constant 2 : i32
    %40 = vector.broadcast %c2_i32 : i32 to vector<2x128xi32>
    %41 = arith.cmpi sge, %35, %40 : vector<2x128xi32>
    %cst_17 = arith.constant 0.000000e+00 : f32
    %42 = vector.broadcast %cst_17 : f32 to vector<2x128xf32>
    %43 = arith.cmpf ogt, %36, %42 : vector<2x128xf32>
    %44 = arith.andi %41, %43 : vector<2x128xi1>
    %c2_i32_18 = arith.constant 2 : i32
    %45 = vector.broadcast %c2_i32_18 : i32 to vector<2x128xi32>
    %46 = arith.cmpi slt, %35, %45 : vector<2x128xi32>
    %c0_19 = arith.constant 0 : index
    %c0_20 = arith.constant 0 : index
    %c0_21 = arith.constant 0 : index
    %47 = vector.load %arg7[%c0_19, %c0_20, %c0_21] : memref<8x2x128xf32, #tpu.memory_space<vmem>>, vector<1x2x128xf32>
    %48 = vector.shape_cast %47 : vector<1x2x128xf32> to vector<2x128xf32>
    %cst_22 = arith.constant -1.000000e+30 : f32
    %49 = vector.broadcast %cst_22 : f32 to vector<2x128xf32>
    %50 = arith.select %46, %48, %49 : vector<2x128xi1>, vector<2x128xf32>
    %c1_i32_23 = arith.constant 1 : i32
    %c7_i32 = arith.constant 7 : i32
    %51 = arith.addi %c1_i32_23, %c7_i32 : i32
    %c1_i32_24 = arith.constant 1 : i32
    %52 = scf.for %arg8 = %c1_i32_23 to %51 step %c1_i32_24 iter_args(%arg9 = %50) -> (vector<2x128xf32>)  : i32 {
      %72 = arith.index_cast %arg8 : i32 to index
      %c0_35 = arith.constant 0 : index
      %c0_36 = arith.constant 0 : index
      %73 = vector.load %arg7[%72, %c0_35, %c0_36] : memref<8x2x128xf32, #tpu.memory_space<vmem>>, vector<1x2x128xf32>
      %74 = vector.shape_cast %73 : vector<1x2x128xf32> to vector<2x128xf32>
      %c1_i32_37 = arith.constant 1 : i32
      %75 = tpu.dynamic_rotate %arg9 by %c1_i32_37 dim 1 : vector<2x128xf32>, i32 -> vector<2x128xf32>
      %cst_38 = arith.constant -1.000000e+30 : f32
      %76 = vector.broadcast %cst_38 : f32 to vector<2x128xf32>
      %77 = arith.select %39, %75, %76 : vector<2x128xi1>, vector<2x128xf32>
      %c2_i32_39 = arith.constant 2 : i32
      %78 = tpu.dynamic_rotate %arg9 by %c2_i32_39 dim 1 : vector<2x128xf32>, i32 -> vector<2x128xf32>
      %cst_40 = arith.constant -1.000000e+30 : f32
      %79 = vector.broadcast %cst_40 : f32 to vector<2x128xf32>
      %80 = arith.select %44, %78, %79 : vector<2x128xi1>, vector<2x128xf32>
      %81 = arith.maximumf %77, %80 : vector<2x128xf32>
      %82 = arith.maximumf %arg9, %81 : vector<2x128xf32>
      %83 = arith.subf %arg9, %82 : vector<2x128xf32>
      %84 = math.exp %83 : vector<2x128xf32>
      %85 = arith.subf %77, %82 : vector<2x128xf32>
      %86 = math.exp %85 : vector<2x128xf32>
      %87 = arith.addf %84, %86 : vector<2x128xf32>
      %88 = arith.subf %80, %82 : vector<2x128xf32>
      %89 = math.exp %88 : vector<2x128xf32>
      %90 = arith.addf %87, %89 : vector<2x128xf32>
      %91 = math.log %90 : vector<2x128xf32>
      %92 = arith.addf %82, %91 : vector<2x128xf32>
      %93 = vector.broadcast %arg8 : i32 to vector<2x128xi32>
      %94 = arith.cmpi slt, %93, %37 : vector<2x128xi32>
      %95 = arith.addf %92, %74 : vector<2x128xf32>
      %96 = arith.select %94, %95, %arg9 : vector<2x128xi1>, vector<2x128xf32>
      scf.yield %96 : vector<2x128xf32>
    }
    %c7_i32_25 = arith.constant 7 : i32
    %c0_26 = arith.constant 0 : index
    %c0_27 = arith.constant 0 : index
    %53 = vector.load %arg5[%c0_26, %c0_27] : memref<2x128xf32, #tpu.memory_space<vmem>>, vector<2x128xf32>
    %cst_28 = arith.constant 0.000000e+00 : f32
    %54 = vector.broadcast %cst_28 : f32 to vector<2x128xf32>
    %55 = arith.cmpf ogt, %53, %54 : vector<2x128xf32>
    %cst_29 = arith.constant -1.000000e+30 : f32
    %56 = vector.broadcast %cst_29 : f32 to vector<2x128xf32>
    %57 = arith.select %55, %52, %56 : vector<2x128xi1>, vector<2x128xf32>
    %cst_30 = arith.constant dense<0xFF800000> : vector<2xf32>
    %58 = vector.multi_reduction <maximumf>, %57, %cst_30 [1] : vector<2x128xf32> to vector<2xf32>
    %59 = vector.shape_cast %58 : vector<2xf32> to vector<2x1xf32>
    %60 = vector.broadcast %59 : vector<2x1xf32> to vector<2x128xf32>
    %61 = arith.subf %57, %60 : vector<2x128xf32>
    %62 = math.exp %61 : vector<2x128xf32>
    %cst_31 = arith.constant dense<0.000000e+00> : vector<2xf32>
    %63 = vector.multi_reduction <add>, %62, %cst_31 [1] : vector<2x128xf32> to vector<2xf32>
    %64 = vector.shape_cast %63 : vector<2xf32> to vector<2x1xf32>
    %65 = math.log %64 : vector<2x1xf32>
    %66 = arith.addf %59, %65 : vector<2x1xf32>
    %cst_32 = arith.constant 0.000000e+00 : f32
    %67 = vector.broadcast %cst_32 : f32 to vector<2x1xf32>
    %68 = arith.subf %67, %66 : vector<2x1xf32>
    %69 = vector.shape_cast %68 : vector<2x1xf32> to vector<2x1xf32>
    %70 = vector.broadcast %69 : vector<2x1xf32> to vector<2x128xf32>
    %c0_33 = arith.constant 0 : index
    %c0_34 = arith.constant 0 : index
    %71 = vector.load %arg6[%c0_33, %c0_34] : memref<2x128xf32, #tpu.memory_space<vmem>>, vector<2x128xf32>
    tpu.vector_store %arg6[%c0_33, %c0_34], %70 {strides = array<i32>} : memref<2x128xf32, #tpu.memory_space<vmem>>, vector<2x128xf32>,
    return
  }
  func.func @transform_0(%arg0: i32) -> (i32, i32, i32) {
    %c0_i32 = arith.constant 0 : i32
    %c0_i32_0 = arith.constant 0 : i32
    %c0_i32_1 = arith.constant 0 : i32
    return %arg0, %c0_i32, %c0_i32_0 : i32, i32, i32
  }
  func.func @transform_1(%arg0: i32) -> (i32, i32, i32) {
    %c0_i32 = arith.constant 0 : i32
    %c0_i32_0 = arith.constant 0 : i32
    %c0_i32_1 = arith.constant 0 : i32
    return %arg0, %c0_i32, %c0_i32_0 : i32, i32, i32
  }
  func.func @transform_2(%arg0: i32) -> (i32, i32) {
    %c0_i32 = arith.constant 0 : i32
    %c0_i32_0 = arith.constant 0 : i32
    return %arg0, %c0_i32 : i32, i32
  }
  func.func @transform_3(%arg0: i32) -> (i32, i32) {
    %c0_i32 = arith.constant 0 : i32
    %c0_i32_0 = arith.constant 0 : i32
    return %arg0, %c0_i32 : i32, i32
  }
  func.func @transform_4(%arg0: i32) -> (i32, i32) {
    %c0_i32 = arith.constant 0 : i32
    %c0_i32_0 = arith.constant 0 : i32
    return %arg0, %c0_i32 : i32, i32
  }
  func.func @transform_5(%arg0: i32) -> (i32, i32) {
    %c0_i32 = arith.constant 0 : i32
    %c0_i32_0 = arith.constant 0 : i32
    return %arg0, %c0_i32 : i32, i32
  }
}

</mosaic_0001>

<bundles_post_ra>
// kernel: tpu_custom_call.1
= control target key start
LH: loop header
LB: loop body
LE: loop exit
PB: predicated region body
PF: predicated region fallthrough
CT: control target
= control target key end

     0   :  { %10 = vsyncpa [#allocation4], 0  ;;  %s919_s0 = inlined_call_operand.hbm [shape: f32[8,2,32], index: 0, kind: input, shape index: {}]   ;;  %s920_s1 = inlined_call_operand.vmem [shape: s32[2,1,128], index: 1, kind: input, shape index: {}]   ;;  %s921_s2 = inlined_call_operand.vmem [shape: f32[2,128], index: 2, kind: input, shape index: {}]   ;;  %s922_s3 = inlined_call_operand.vmem [shape: s32[2,128], index: 3, kind: input, shape index: {}]   ;;  %s923_s4 = inlined_call_operand.vmem [shape: f32[2,128], index: 4, kind: input, shape index: {}]   ;;  %s924_s5 = inlined_call_operand.hbm [shape: f32[2,128], index: 5, kind: output, shape index: {}]  }
   0x1   :  { %11 = vsyncpa [#allocation5], 0  ;;  %s745_s18 = smov [#allocation3]   ;;  %s681_s22 = scalar_lea.hbm %s919_s0, 256 }
   0x2   :  { %s17_s19 = sshll.u32 %s745_s18, 4  ;;  %p682_p0 = scmp.ne.s32.totalorder %s919_s0, %s681_s22  ;;  %s18_s19 = int_to_ptr.vmem [resolvable:$true] %s17_s19 }
   0x3   :  { %p685_p1 = scmp.lt.u32.totalorder %s681_s22, %s919_s0 }
   0x5   :  { %p687_p2 = pnand %p685_p1, %p682_p0 }
   0x7   :  { %690 = shalt.err (!%p687_p2)
}
   0x8   :  { %s691_s27 = scalar_lea.vmem %s18_s19, 256  ;;  %p696_p4 = scmp.lt.s32.totalorder %s18_s19, %s18_s19 }
   0x9   :  { %p692_p3 = scmp.ne.s32.totalorder %s18_s19, %s691_s27  ;;  %p697_p5 = scmp.lt.s32.totalorder %s691_s27, %s691_s27 }
   0xb   :  { %p698_p6 = por %p697_p5, %p696_p4 }
   0xd   :  { %p699_p7 = pnand %p698_p6, %p692_p3 }
   0xf   :  { %702 = shalt.err (!%p699_p7)
}
  0x10   :  { %s746_s28 = smov 32   ;;  %s747_s29 = smov 2  }
  0x11   :  { %23 = dma.hbm_to_vmem [thread:$0]  %s919_s0, 256, %s18_s19, [#allocation4], %s746_s28, %s746_s28, %s747_s29  }
  0x12   :  { %733 = dma.done.wait [#allocation4], 256  }
  0x13   :  { %734 = vsyncadd [#allocation4], 4294967040  ;;  %vm43_vm0 = vcmask 254976   ;;  %v802_v0 = vld [vmem:[%s922_s3] sm:$0x3]  ;;  %v144_v57 = vlaneseq  ;;  %v748_v62 = vmov 0.0|0.0  }
  0x14   :  { %v35_v1 = vld [vmem:[#allocation3] sm:$0x3]  ;;  %v37_v2 = vld [vmem:[#allocation3 + $0x4] sm:$0x3]  ;;  %v36_v5 = vld [vmem:[#allocation3 + $0x2] sm:$0x3]  ;;  %597 = vmatprep.subr.bf16.mxu0 %v748_v62  ;;  %603 = vmatprep.subr.bf16.mxu1 %v748_v62 }
  0x15   :  { %v44_v3 = vsel %vm43_vm0, %v35_v1, -inf  ;;  %v50_v4 = vsel %vm43_vm0, %v37_v2, -inf  ;;  %v38_v6 = vld [vmem:[#allocation3 + $0x6] sm:$0x3]  ;;  %v47_v7 = vsel %vm43_vm0, %v36_v5, -inf  ;;  %v845_v58 = vshrl.u32 %v144_v57, 7 }
  0x16   :  { %45 = vmax.xlane.f32.xlu0 %v44_v3  ;;  %51 = vmax.xlane.f32.xlu1 %v50_v4  ;;  %v53_v8 = vsel %vm43_vm0, %v38_v6, -inf  ;;  %v39_v9 = vld [vmem:[#allocation3 + $0x8] sm:$0x3]  ;;  %v40_v10 = vld [vmem:[#allocation3 + $0xa] sm:$0x3]  ;;  %vm750_vm12 = vmmov 0  }
  0x17   :  { %v56_v11 = vsel %vm43_vm0, %v39_v9, -inf  ;;  %v59_v12 = vsel %vm43_vm0, %v40_v10, -inf  ;;  %v41_v13 = vld [vmem:[#allocation3 + $0xc] sm:$0x3]  ;;  %v42_v14 = vld [vmem:[#allocation3 + $0xe] sm:$0x3] }
  0x18   :  { %v62_v15 = vsel %vm43_vm0, %v41_v13, -inf  ;;  %v65_v16 = vsel %vm43_vm0, %v42_v14, -inf  ;;  %v194_v59 = vadd.s32 8, %v845_v58  ;;  %v540_v60 = vld [vmem:[%s920_s1] ss:$0 sm:$0xff]  ;;  %v751_v3 = vmov 0.0  }
  0x19   :  { %v541_v61 = vld [vmem:[%s920_s1 + $0x1] ss:$0 sm:$0xff]  ;;  %vm205_vm1 = vcmp.eq.s32.totalorder %v540_v60, %v845_v58  ;;  %v749_v63 = vmov 1.0|1.0   ;;  %583 = vmatprep.mubr.msk.f32.mxu0 %vm750_vm12, %v751_v3  ;;  %594 = vmatprep.mubr.msk.f32.mxu1 %vm750_vm12, %v751_v3  ;;  %vm229_vm14 = vcmask 261120  }
  0x1a   :  { %48 = vmax.xlane.f32.xlu0 %v47_v7  ;;  %54 = vmax.xlane.f32.xlu1 %v53_v8  ;;  %vm206_vm2 = vcmp.eq.s32.totalorder %v540_v60, %v194_v59  ;;  %vm209_vm3 = vcmp.eq.s32.totalorder %v541_v61, %v845_v58  ;;  %vm210_vm5 = vcmp.eq.s32.totalorder %v541_v61, %v194_v59 }
  0x1b   :  { %vm598_vm4 = vmpackc.low %vm206_vm2, %vm205_vm1 }
  0x1c   :  { %599 = vmatpush3.bf16.msk.msra.mxu0 %vm598_vm4, %v749_v63  ;;  %vm604_vm6 = vmpackc.low %vm210_vm5, %vm209_vm3 }
  0x1d   :  { %605 = vmatpush3.bf16.msk.msra.mxu1 %vm604_vm6, %v749_v63  ;;  %600 = vmatprep.subr.bf16.mxu0 %v748_v62 }
  0x1e   :  { %57 = vmax.xlane.f32.xlu0 %v56_v11  ;;  %60 = vmax.xlane.f32.xlu1 %v59_v12 }
  0x1f   :  { %606 = vmatprep.subr.bf16.mxu1 %v748_v62 }
  0x22   :  { %63 = vmax.xlane.f32.xlu0 %v62_v15  ;;  %66 = vmax.xlane.f32.xlu1 %v65_v16 }
  0xa3   :  { %v46_v17 = vpop.xlane.xlu0 %45  ;;  %v52_v18 = vpop.xlane.xlu1 %51 }
  0xa4   :  { %v812_v19 = vsub.f32 %v35_v1, %v46_v17  ;;  %v814_v20 = vsub.f32 %v37_v2, %v52_v18  ;;  %v195_v1 = vadd.s32 16, %v845_v58  ;;  %v196_v2 = vadd.s32 24, %v845_v58 }
  0xa5   :  { %v752_v17 = vmov 1983009808  }
  0xa6   :  { %v76_v21 = vmul.f32 1.442695, %v812_v19  ;;  %v80_v22 = vmul.f32 1.442695, %v814_v20  ;;  %vm207_vm7 = vcmp.eq.s32.totalorder %v540_v60, %v195_v1  ;;  %vm208_vm8 = vcmp.eq.s32.totalorder %v540_v60, %v196_v2 }
  0xa7   :  { %v49_v23 = vpop.xlane.xlu0 %48  ;;  %v55_v24 = vpop.xlane.xlu1 %54  ;;  %vm211_vm9 = vcmp.eq.s32.totalorder %v541_v61, %v195_v1  ;;  %vm212_vm10 = vcmp.eq.s32.totalorder %v541_v61, %v196_v2  ;;  %vm601_vm11 = vmpackc.low %vm208_vm8, %vm207_vm7  ;;  %v142_v18 = vunpack.c.l.s4 %v752_v17 }
  0xa8   :  { %637 = vpow2.f32 %v76_v21  ;;  %v818_v25 = vsub.f32 %v36_v5, %v49_v23  ;;  %v820_v26 = vsub.f32 %v38_v6, %v55_v24  ;;  %602 = vmatpush3.bf16.msk.msra.mxu0 %vm601_vm11, %v749_v63  ;;  %vm607_vm13 = vmpackc.low %vm212_vm10, %vm211_vm9 }
  0xa9   :  { %639 = vpow2.f32 %v80_v22  ;;  %608 = vmatpush3.bf16.msk.msra.mxu1 %vm607_vm13, %v749_v63 }
  0xaa   :  { %v78_v27 = vmul.f32 1.442695, %v818_v25  ;;  %v82_v28 = vmul.f32 1.442695, %v820_v26 }
  0xab   :  { %v58_v29 = vpop.xlane.xlu0 %57  ;;  %v61_v30 = vpop.xlane.xlu1 %60 }
  0xac   :  { %641 = vpow2.f32 %v78_v27  ;;  %v824_v31 = vsub.f32 %v39_v9, %v58_v29  ;;  %v826_v32 = vsub.f32 %v40_v10, %v61_v30 }
  0xad   :  { %643 = vpow2.f32 %v82_v28 }
  0xae   :  { %v84_v33 = vmul.f32 1.442695, %v824_v31  ;;  %v86_v34 = vmul.f32 1.442695, %v826_v32 }
  0xaf   :  { %v64_v35 = vpop.xlane.xlu0 %63  ;;  %v67_v36 = vpop.xlane.xlu1 %66 }
  0xb0   :  { %645 = vpow2.f32 %v84_v33  ;;  %v830_v37 = vsub.f32 %v41_v13, %v64_v35  ;;  %v832_v38 = vsub.f32 %v42_v14, %v67_v36  ;;  %v143_v33 = vunpack.c.0.s8 %v142_v18 }
  0xb1   :  { %647 = vpow2.f32 %v86_v34 }
  0xb2   :  { %v638_v39 = vpop.eup %637  ;;  %v88_v40 = vmul.f32 1.442695, %v830_v37  ;;  %v90_v41 = vmul.f32 1.442695, %v832_v38 }
  0xb3   :  { %v640_v42 = vpop.eup %639  ;;  %v92_v43 = vsel %vm43_vm0, %v638_v39, 0.0  ;;  %v753_v39 = vmov 1934713408  }
  0xb4   :  { %649 = vpow2.f32 %v88_v40  ;;  %93 = vadd.xlane.f32.xlu0 %v92_v43  ;;  %v98_v44 = vsel %vm43_vm0, %v640_v42, 0.0  ;;  %v174_v40 = vunpack.c.l.s4 %v753_v39 }
  0xb5   :  { %651 = vpow2.f32 %v90_v41 }
  0xb6   :  { %v642_v45 = vpop.eup %641 }
  0xb7   :  { %v644_v46 = vpop.eup %643  ;;  %v95_v47 = vsel %vm43_vm0, %v642_v45, 0.0 }
  0xb8   :  { %99 = vadd.xlane.f32.xlu0 %v98_v44  ;;  %96 = vadd.xlane.f32.xlu1 %v95_v47  ;;  %v101_v48 = vsel %vm43_vm0, %v644_v46, 0.0 }
  0xba   :  { %v646_v49 = vpop.eup %645 }
  0xbb   :  { %v648_v50 = vpop.eup %647  ;;  %v104_v51 = vsel %vm43_vm0, %v646_v49, 0.0 }
  0xbc   :  { %102 = vadd.xlane.f32.xlu1 %v101_v48  ;;  %105 = vadd.xlane.f32.xlu0 %v104_v51  ;;  %v107_v52 = vsel %vm43_vm0, %v648_v50, 0.0  ;;  %v175_v48 = vunpack.c.0.s8 %v174_v40 }
  0xbe   :  { %v650_v53 = vpop.eup %649 }
  0xbf   :  { %v652_v54 = vpop.eup %651  ;;  %v110_v55 = vsel %vm43_vm0, %v650_v53, 0.0 }
  0xc0   :  { %108 = vadd.xlane.f32.xlu1 %v107_v52  ;;  %111 = vadd.xlane.f32.xlu0 %v110_v55  ;;  %v113_v56 = vsel %vm43_vm0, %v652_v54, 0.0 }
  0xc4   :  { %114 = vadd.xlane.f32.xlu1 %v113_v56 }
 0x141   :  { %v94_v4 = vpop.xlane.xlu0 %93 }
 0x145   :  { %v97_v5 = vpop.xlane.xlu1 %96  ;;  %v100_v6 = vpop.xlane.xlu0 %99 }
 0x146   :  { %653 = vlog2.f32 %v97_v5 }
 0x147   :  { %655 = vlog2.f32 %v100_v6 }
 0x148   :  { %657 = vlog2.f32 %v94_v4 }
 0x149   :  { %v103_v7 = vpop.xlane.xlu1 %102  ;;  %v106_v8 = vpop.xlane.xlu0 %105 }
 0x14a   :  { %659 = vlog2.f32 %v103_v7 }
 0x14b   :  { %661 = vlog2.f32 %v106_v8 }
 0x14d   :  { %v109_v9 = vpop.xlane.xlu1 %108  ;;  %v112_v10 = vpop.xlane.xlu0 %111 }
 0x14e   :  { %663 = vlog2.f32 %v109_v9 }
 0x14f   :  { %665 = vlog2.f32 %v112_v10 }
 0x150   :  { %v654_v11 = vpop.eup %653 }
 0x151   :  { %v115_v12 = vpop.xlane.xlu1 %114  ;;  %v656_v13 = vpop.eup %655  ;;  %v119_v16 = vmul.f32 0.6931472, %v654_v11 }
 0x152   :  { %667 = vlog2.f32 %v115_v12  ;;  %v658_v14 = vpop.eup %657  ;;  %v121_v21 = vmul.f32 0.6931472, %v656_v13 }
 0x153   :  { %v117_v24 = vmul.f32 0.6931472, %v658_v14  ;;  %v133_v30 = vsub.f32 %v818_v25, %v119_v16 }
 0x154   :  { %v660_v15 = vpop.eup %659  ;;  %v134_v34 = vsub.f32 %v814_v20, %v121_v21 }
 0x155   :  { %v123_v22 = vmul.f32 0.6931472, %v660_v15  ;;  %v662_v23 = vpop.eup %661  ;;  %v132_v41 = vsub.f32 %v812_v19, %v117_v24 }
 0x156   :  { %v125_v35 = vmul.f32 0.6931472, %v662_v23 }
 0x157   :  { %v135_v27 = vsub.f32 %v820_v26, %v123_v22  ;;  %v146_v26 = vsub.s32 %v143_v33, %v845_v58  ;;  %v140_v46 = vcombine.low %v132_v41, %v134_v34 }
 0x158   :  { %v664_v28 = vpop.eup %663  ;;  %v136_v47 = vsub.f32 %v824_v31, %v125_v35 }
 0x159   :  { %v666_v29 = vpop.eup %665  ;;  %v148_v42 = vcombine.low %v133_v30, %v135_v27  ;;  %v127_v43 = vmul.f32 0.6931472, %v664_v28  ;;  %v147_v52 = vrot.slane %v140_v46, %v146_v26 }
 0x15a   :  { %v129_v36 = vmul.f32 0.6931472, %v666_v29 }
 0x15b   :  { %v155_v49 = vrot.slane %v148_v42, %v146_v26  ;;  %v137_v20 = vsub.f32 %v826_v32, %v127_v43  ;;  %v871_v32 = vand.u32 127, %v144_v57 }
 0x15c   :  { %v668_v44 = vpop.eup %667  ;;  %v138_v45 = vsub.f32 %v830_v37, %v129_v36  ;;  %v178_v37 = vsub.s32 %v175_v48, %v845_v58 }
 0x15d   :  { %v131_v25 = vmul.f32 0.6931472, %v668_v44  ;;  %v172_v53 = vcombine.low %v147_v52, %v155_v49  ;;  %vm454_vm0 = vcmp.ge.s32.totalorder %v871_v32, 1  ;;  %vm455_vm1 = vcmp.ge.s32.totalorder %v871_v32, 2 }
 0x15e   :  { %v156_v50 = vcombine.low %v136_v47, %v138_v45  ;;  %vm458_vm3 = vcmp.lt.s32.totalorder %v871_v32, 2 }
 0x15f   :  { %v139_v51 = vsub.f32 %v832_v38, %v131_v25  ;;  %v179_v59 = vrot.slane %v172_v53, %v178_v37  ;;  %v452_v38 = vld [vmem:[%s921_s2] sm:$0x3]  ;;  %s889_s2 = smov 1  }
 0x160   :  { %v163_v54 = vrot.slane %v156_v50, %v146_v26  ;;  %vm456_vm15 = vcmp.gt.f32.partialorder %v452_v38, 0.0 }
 0x161   :  { %v164_v19 = vcombine.low %v137_v20, %v139_v51  ;;  %vm878_vm2 = vmand %vm455_vm1, %vm456_vm15 }
 0x163   :  { %v171_v55 = vrot.slane %v164_v19, %v146_v26 }
 0x165   :  { %v180_v56 = vcombine.low %v163_v54, %v171_v55 }
 0x167   :  { %v187_v60 = vrot.slane %v180_v56, %v178_v37 }
 0x169   :  { %v188_v31 = vcombine.low %v179_v59, %v187_v60  ;;  %v189_v61 = vcombine.high %v179_v59, %v187_v60 }
 0x16b   :  { %584 = vmatmul.mubr.msk.f32.vlgmr.msra.gmra.mrb[0].mxu0 %vm229_vm14, %v188_v31  ;;  %595 = vmatmul.mubr.msk.f32.vlgmr.msra.gmra.mrb[0].mxu1 %vm229_vm14, %v189_v61 }
 0x23e   :  { %v299_v62 = vpop.f32.mrb[0].mxu0  ;;  %v372_v63 = vpop.f32.mrb[0].mxu1 }
 0x23f   :  { %v376_v1 = vcombine.high %v299_v62, %v751_v3  ;;  %v383_v2 = vrot.slane %v299_v62, %v146_v26  ;;  %v391_v57 = vcombine.high %v372_v63, %v751_v3  ;;  %v398_v4 = vrot.slane %v372_v63, %v146_v26  ;;  %v585_v5 = vpop.f32.mrb[1].mxu0  ;;  %v596_v6 = vpop.f32.mrb[1].mxu1 }
 0x241   :  { %v390_v7 = vrot.slane %v376_v1, %v146_v26  ;;  %v405_v8 = vrot.slane %v391_v57, %v146_v26  ;;  %v406_v9 = vcombine.low %v383_v2, %v398_v4  ;;  %v407_v10 = vcombine.high %v383_v2, %v398_v4 }
 0x243   :  { %v414_v11 = vrot.slane %v406_v9, %v178_v37  ;;  %v421_v12 = vrot.slane %v407_v10, %v178_v37  ;;  %v422_v13 = vcombine.low %v390_v7, %v405_v8  ;;  %v423_v14 = vcombine.high %v390_v7, %v405_v8  ;;  %560 = vst.sshfl [vmem:[#allocation2] sm:$0x11 pattern:$0x73516240] %v406_v9 }
 0x244   :  { %561 = vst.sshfl [vmem:[#allocation2 + $0x4] sm:$0x11 pattern:$0x73516240] %v407_v10 }
 0x245   :  { %v430_v15 = vrot.slane %v422_v13, %v178_v37  ;;  %v437_v16 = vrot.slane %v423_v14, %v178_v37  ;;  %v438_v17 = vcombine.high %v414_v11, %v751_v3  ;;  %v439_v18 = vcombine.high %v421_v12, %v751_v3  ;;  %562 = vst.sshfl [vmem:[#allocation2 + $0x8] sm:$0x11 pattern:$0x73516240] %v422_v13 }
 0x246   :  { %563 = vst.sshfl [vmem:[#allocation2 + $0xc] sm:$0x11 pattern:$0x73516240] %v423_v14 }
 0x247   :  { %v440_v21 = vcombine.high %v430_v15, %v751_v3  ;;  %v441_v22 = vcombine.high %v437_v16, %v751_v3  ;;  %443 = vst [vmem:[#allocation2 + $0x2] sm:$0x3] %v438_v17  ;;  %445 = vst [vmem:[#allocation2 + $0x6] sm:$0x3] %v439_v18 }
 0x249   :  { %447 = vst [vmem:[#allocation2 + $0xa] sm:$0x3] %v440_v21  ;;  %449 = vst [vmem:[#allocation2 + $0xe] sm:$0x3] %v441_v22 }
 0x24a   :  { %v459_v23 = vld [vmem:[#allocation2] sm:$0x3] }
 0x24b   :  { %v460_v24 = vsel %vm458_vm3, %v459_v23, -1e+30  }
 0x24c   :  { %v737_v27 = vmov %v460_v24  }
 0x24d LB: > { %s754_s12 = smov 1   ;;  %s755_s13 = smov 2   ;;  %v493_v25 = vstv %s743_s2  ;;  %s743_s2 = sphi %s889_s2, %s466_s2   ;;  %v739_v27 = vphi %v737_v27, %v738_v27  }
 0x24e   : > { %471 = vrot.lane.b32.xlu0 %v739_v27, %s754_s12  ;;  %s564_s14 = sshll.u32 %s743_s2, 1  ;;  %vm494_vm4 = vcmp.lt.s32.totalorder %v493_v25, %v802_v0  ;;  %s466_s2 = sadd.s32 1, %s743_s2  }
 0x24f   : > { %s469_s15 = scalar_lea.vmem [#allocation2], %s564_s14  ;;  %p463_p8 = scmp.ge.s32.totalorder %s466_s2, 8  }
 0x250   : > { %v470_v49 = vld [vmem:[%s469_s15] sm:$0x3]  ;;  %vm500_vm5 = vcmask (%p463_p8), 1041408   ;;  %s756_s18 = smov (%p463_p8), [#allocation6]  }
 0x251   :  { %v497_v52 = vld [vmem:[%s923_s4] sm:$0x3] (%p463_p8)  ;;  %s521_s19 = sshll.u32 (%p463_p8), %s756_s18, 4  ;;  %s522_s19 = int_to_ptr.vmem [resolvable:$true] %s521_s19 }
 0x252   : > { %474 = vrot.lane.b32.xlu0 %v739_v27, %s755_s13  ;;  %vm498_vm6 = vcmp.gt.f32.partialorder (%p463_p8), %v497_v52, 0.0  ;;  %s703_s4 = scalar_lea.vmem (%p463_p8), %s522_s19, 32  ;;  %p708_p10 = scmp.lt.s32.totalorder (%p463_p8), %s522_s19, %s522_s19 }
 0x253   :  { %p704_p9 = scmp.ne.s32.totalorder (%p463_p8), %s522_s19, %s703_s4  ;;  %p709_p11 = scmp.lt.s32.totalorder (%p463_p8), %s703_s4, %s703_s4 }
 0x255   :  { %p710_p12 = por (%p463_p8), %p709_p11, %p708_p10 }
 0x257   :  { %p711_p13 = pnand (%p463_p8), %p710_p12, %p704_p9 }
 0x2c0   : > { %v472_v3 = vpop.permute.xlu0 %471 }
 0x2c1   : > { %v473_v29 = vsel %vm454_vm0, %v472_v3, -1e+30 }
 0x2c4   : > { %v475_v28 = vpop.permute.xlu0 %474 }
 0x2c5   : > { %v476_v30 = vsel %vm878_vm2, %v475_v28, -1e+30 }
 0x2c6   : > { %v477_v33 = vmax.f32 %v473_v29, %v476_v30 }
 0x2c8   : > { %v478_v34 = vmax.f32 %v739_v27, %v477_v33 }
 0x2ca   : > { %v479_v35 = vsub.f32 %v739_v27, %v478_v34  ;;  %v482_v36 = vsub.f32 %v473_v29, %v478_v34  ;;  %v486_v39 = vsub.f32 %v476_v30, %v478_v34 }
 0x2cc   : > { %v480_v40 = vmul.f32 1.442695, %v479_v35  ;;  %v483_v41 = vmul.f32 1.442695, %v482_v36  ;;  %v487_v42 = vmul.f32 1.442695, %v486_v39 }
 0x2ce   : > { %669 = vpow2.f32 %v480_v40 }
 0x2cf   : > { %671 = vpow2.f32 %v483_v41 }
 0x2d0   : > { %673 = vpow2.f32 %v487_v42 }
 0x2d8   : > { %v670_v43 = vpop.eup %669 }
 0x2d9   : > { %v672_v44 = vpop.eup %671 }
 0x2da   : > { %v485_v45 = vadd.f32 %v672_v44, %v670_v43  ;;  %v674_v26 = vpop.eup %673 }
 0x2dc   : > { %v489_v46 = vadd.f32 %v674_v26, %v485_v45 }
 0x2de   : > { %675 = vlog2.f32 %v489_v46 }
 0x2e8   : > { %v676_v47 = vpop.eup %675 }
 0x2e9   : > { %v491_v48 = vmul.f32 0.6931472, %v676_v47 }
 0x2ea   :  { %465 = sbr.rel (!%p463_p8) target bundleno = 589 (0x24d), region = 52 }
 0x2eb   : > { %v492_v20 = vadd.f32 %v491_v48, %v478_v34 }
 0x2ed   : > { %v495_v50 = vadd.f32 %v492_v20, %v470_v49 }
 0x2ef   : > { %v496_v51 = vsel %vm494_vm4, %v495_v50, %v739_v27  }
 0x2f0   : > { %v738_v27 = vmov %v496_v51   ;;  %v499_v19 = vsel (%p463_p8), %vm498_vm6, %v496_v51, -1e+30 }
 0x2f1   :  { %v501_v53 = vsel %vm500_vm5, %v499_v19, -inf }
 0x2f2   :  { %502 = vmax.xlane.f32.xlu0 %v501_v53 }
 0x37f   :  { %v503_v54 = vpop.xlane.xlu0 %502 }
 0x380   :  { %v504_v55 = vsub.f32 %v499_v19, %v503_v54 }
 0x382   :  { %v505_v37 = vmul.f32 1.442695, %v504_v55 }
 0x384   :  { %677 = vpow2.f32 %v505_v37 }
 0x38e   :  { %v678_v56 = vpop.eup %677 }
 0x38f   :  { %v507_v59 = vsel %vm500_vm5, %v678_v56, 0.0 }
 0x390   :  { %508 = vadd.xlane.f32.xlu0 %v507_v59 }
 0x41d   :  { %v509_v60 = vpop.xlane.xlu0 %508 }
 0x41e   :  { %679 = vlog2.f32 %v509_v60 }
 0x428   :  { %v680_v31 = vpop.eup %679 }
 0x429   :  { %v511_v61 = vmul.f32 0.6931472, %v680_v31 }
 0x42b   :  { %v512_v0 = vadd.f32 %v511_v61, %v503_v54 }
 0x42d   :  { %v513_v32 = vsub.f32 0.0, %v512_v0 }
 0x42f   :  { %514 = vst [vmem:[#allocation6] sm:$0x3] %v513_v32 }
 0x430   :  { %714 = shalt.err (!%p711_p13)
}
 0x431   :  { %s715_s22 = scalar_lea.hbm %s924_s5, 32 }
 0x432   :  { %p716_p0 = scmp.ne.s32.totalorder %s924_s5, %s715_s22  ;;  %p719_p1 = scmp.lt.u32.totalorder %s715_s22, %s924_s5 }
 0x434   :  { %p721_p2 = pnand %p719_p1, %p716_p0 }
 0x436   :  { %724 = shalt.err (!%p721_p2)
}
 0x437   :  { %524 = dma.vmem_to_hbm [thread:$0]  %s522_s19, 32, %s924_s5, [#allocation5]  }
 0x438   :  { %735 = dma.done.wait [#allocation5], 32  }
 0x439   :  { %736 = vsyncadd [#allocation5], 4294967264 }
 0x43a   :  { %528 = vsyncpa [#allocation4], 1 }
 0x43b   :  { %529 = vsyncpa [#allocation5], 1 }

// kernel: tpu_custom_call.1
= control target key start
LH: loop header
LB: loop body
LE: loop exit
PB: predicated region body
PF: predicated region fallthrough
CT: control target
= control target key end

     0   :  { %10 = vsyncpa [#allocation4], 0  ;;  %s765_s0 = inlined_call_operand.hbm [shape: f32[2,8,32], index: 0, kind: input, shape index: {}]   ;;  %s766_s1 = inlined_call_operand.vmem [shape: s32[2,1,128], index: 1, kind: input, shape index: {}]   ;;  %s767_s2 = inlined_call_operand.vmem [shape: f32[2,128], index: 2, kind: input, shape index: {}]   ;;  %s768_s3 = inlined_call_operand.vmem [shape: s32[2,128], index: 3, kind: input, shape index: {}]   ;;  %s769_s4 = inlined_call_operand.vmem [shape: f32[2,128], index: 4, kind: input, shape index: {}]   ;;  %s770_s5 = inlined_call_operand.hbm [shape: f32[2,128], index: 5, kind: output, shape index: {}]  }
   0x1   :  { %11 = vsyncpa [#allocation5], 0  ;;  %s653_s18 = smov [#allocation3]   ;;  %s589_s22 = scalar_lea.hbm %s765_s0, 256 }
   0x2   :  { %s17_s19 = sshll.u32 %s653_s18, 4  ;;  %p590_p0 = scmp.ne.s32.totalorder %s765_s0, %s589_s22  ;;  %s18_s19 = int_to_ptr.vmem [resolvable:$true] %s17_s19 }
   0x3   :  { %p593_p1 = scmp.lt.u32.totalorder %s589_s22, %s765_s0 }
   0x5   :  { %p595_p2 = pnand %p593_p1, %p590_p0 }
   0x7   :  { %598 = shalt.err (!%p595_p2)
}
   0x8   :  { %s599_s27 = scalar_lea.vmem %s18_s19, 256  ;;  %p604_p4 = scmp.lt.s32.totalorder %s18_s19, %s18_s19 }
   0x9   :  { %p600_p3 = scmp.ne.s32.totalorder %s18_s19, %s599_s27  ;;  %p605_p5 = scmp.lt.s32.totalorder %s599_s27, %s599_s27 }
   0xb   :  { %p606_p6 = por %p605_p5, %p604_p4 }
   0xd   :  { %p607_p7 = pnand %p606_p6, %p600_p3 }
   0xf   :  { %610 = shalt.err (!%p607_p7)
}
  0x10   :  { %s654_s28 = smov 128   ;;  %s655_s29 = smov 8  }
  0x11   :  { %23 = dma.hbm_to_vmem [thread:$0]  %s765_s0, 256, %s18_s19, [#allocation4], %s654_s28, %s654_s28, %s655_s29  }
  0x12   :  { %641 = dma.done.wait [#allocation4], 256  }
  0x13   :  { %642 = vsyncadd [#allocation4], 4294967040  ;;  %vm37_vm0 = vcmask 261120   ;;  %v709_v0 = vld [vmem:[%s768_s3] sm:$0x3]  ;;  %v35_v1 = vld [vmem:[#allocation3] sm:$0xff]  ;;  %v64_v15 = vlaneseq }
  0x14   :  { %v36_v2 = vld [vmem:[#allocation3 + $0x8] sm:$0xff]  ;;  %v38_v3 = vsel %vm37_vm0, %v35_v1, -inf  ;;  %v469_v18 = vld [vmem:[%s766_s1] ss:$0 sm:$0xff]  ;;  %v656_v19 = vmov 0.0|0.0   ;;  %vm658_vm10 = vmmov 0  }
  0x15   :  { %39 = vmax.xlane.f32.xlu0 %v38_v3  ;;  %v41_v4 = vsel %vm37_vm0, %v36_v2, -inf  ;;  %v65_v16 = vshrl.u32 %v64_v15, 7  ;;  %530 = vmatprep.subr.bf16.mxu0 %v656_v19  ;;  %v657_v20 = vmov 1.0|1.0   ;;  %v483_v23 = vld [vmem:[%s766_s1 + $0x1] ss:$0 sm:$0xff] }
  0x16   :  { %536 = vmatprep.subr.bf16.mxu1 %v656_v19  ;;  %v659_v24 = vmov 0.0   ;;  %v721_v25 = vand.u32 127, %v64_v15  ;;  %v381_v26 = vld [vmem:[%s767_s2] sm:$0x3]  ;;  %v660_v36 = vmov 1966171168  }
  0x17   :  { %v66_v17 = vadd.s32 8, %v65_v16  ;;  %vm73_vm1 = vcmp.eq.s32.totalorder %v469_v18, %v65_v16  ;;  %v67_v21 = vadd.s32 16, %v65_v16  ;;  %v68_v22 = vadd.s32 24, %v65_v16  ;;  %516 = vmatprep.mubr.msk.f32.mxu0 %vm658_vm10, %v659_v24  ;;  %527 = vmatprep.mubr.msk.f32.mxu1 %vm658_vm10, %v659_v24  ;;  %s735_s2 = smov 1  }
  0x18   :  { %vm228_vm6 = vcmp.eq.s32.totalorder %v483_v23, %v65_v16  ;;  %vm385_vm14 = vcmp.gt.f32.partialorder %v381_v26, 0.0  ;;  %vm383_vm15 = vcmp.ge.s32.totalorder %v721_v25, 1  ;;  %v161_v37 = vunpack.c.l.s4 %v660_v36 }
  0x19   :  { %42 = vmax.xlane.f32.xlu0 %v41_v4  ;;  %vm74_vm2 = vcmp.eq.s32.totalorder %v469_v18, %v66_v17  ;;  %vm75_vm4 = vcmp.eq.s32.totalorder %v469_v18, %v67_v21  ;;  %vm76_vm5 = vcmp.eq.s32.totalorder %v469_v18, %v68_v22  ;;  %vm229_vm7 = vcmp.eq.s32.totalorder %v483_v23, %v66_v17 }
  0x1a   :  { %vm531_vm3 = vmpackc.low %vm74_vm2, %vm73_vm1  ;;  %vm230_vm11 = vcmp.eq.s32.totalorder %v483_v23, %v67_v21  ;;  %vm231_vm12 = vcmp.eq.s32.totalorder %v483_v23, %v68_v22  ;;  %vm384_vm1 = vcmp.ge.s32.totalorder %v721_v25, 2  ;;  %v162_v38 = vunpack.c.0.s8 %v161_v37 }
  0x1b   :  { %532 = vmatpush3.bf16.msk.msra.mxu0 %vm531_vm3, %v657_v20  ;;  %vm534_vm8 = vmpackc.low %vm76_vm5, %vm75_vm4 }
  0x1c   :  { %533 = vmatprep.subr.bf16.mxu0 %v656_v19  ;;  %vm537_vm9 = vmpackc.low %vm229_vm7, %vm228_vm6  ;;  %v165_v39 = vsub.s32 %v162_v38, %v65_v16 }
  0x1d   :  { %538 = vmatpush3.bf16.msk.msra.mxu1 %vm537_vm9, %v657_v20  ;;  %vm540_vm13 = vmpackc.low %vm231_vm12, %vm230_vm11 }
  0x1e   :  { %539 = vmatprep.subr.bf16.mxu1 %v656_v19  ;;  %vm728_vm2 = vmand %vm384_vm1, %vm385_vm14 }
  0x1f   :  { %535 = vmatpush3.bf16.msk.msra.mxu0 %vm534_vm8, %v657_v20 }
  0x21   :  { %541 = vmatpush3.bf16.msk.msra.mxu1 %vm540_vm13, %v657_v20 }
  0xa2   :  { %v40_v5 = vpop.xlane.xlu0 %39 }
  0xa3   :  { %v44_v6 = vsub.f32 %v35_v1, %v40_v5 }
  0xa5   :  { %v46_v7 = vmul.f32 1.442695, %v44_v6 }
  0xa6   :  { %v43_v8 = vpop.xlane.xlu0 %42 }
  0xa7   :  { %569 = vpow2.f32 %v46_v7  ;;  %v45_v9 = vsub.f32 %v36_v2, %v43_v8 }
  0xa9   :  { %v48_v10 = vmul.f32 1.442695, %v45_v9 }
  0xab   :  { %571 = vpow2.f32 %v48_v10 }
  0xb1   :  { %v570_v11 = vpop.eup %569 }
  0xb2   :  { %v50_v12 = vsel %vm37_vm0, %v570_v11, 0.0 }
  0xb3   :  { %51 = vadd.xlane.f32.xlu1 %v50_v12 }
  0xb5   :  { %v572_v13 = vpop.eup %571 }
  0xb6   :  { %v53_v14 = vsel %vm37_vm0, %v572_v13, 0.0 }
  0xb7   :  { %54 = vadd.xlane.f32.xlu1 %v53_v14 }
 0x140   :  { %v52_v28 = vpop.xlane.xlu1 %51 }
 0x141   :  { %573 = vlog2.f32 %v52_v28 }
 0x144   :  { %v55_v29 = vpop.xlane.xlu1 %54 }
 0x145   :  { %575 = vlog2.f32 %v55_v29 }
 0x14b   :  { %v574_v30 = vpop.eup %573 }
 0x14c   :  { %v57_v31 = vmul.f32 0.6931472, %v574_v30 }
 0x14e   :  { %v60_v32 = vsub.f32 %v44_v6, %v57_v31 }
 0x14f   :  { %v576_v33 = vpop.eup %575 }
 0x150   :  { %v59_v34 = vmul.f32 0.6931472, %v576_v33  ;;  %517 = vmatmul.mubr.msk.f32.vlgmr.msra.gmra.mrb[0].mxu0 %vm37_vm0, %v60_v32 }
 0x152   :  { %v61_v35 = vsub.f32 %v45_v9, %v59_v34 }
 0x154   :  { %528 = vmatmul.mubr.msk.f32.vlgmr.msra.gmra.mrb[0].mxu1 %vm37_vm0, %v61_v35  ;;  %vm387_vm0 = vcmp.lt.s32.totalorder %v721_v25, 2 }
 0x223   :  { %v154_v40 = vpop.f32.mrb[0].mxu0 }
 0x224   :  { %v159_v41 = vcombine.high %v154_v40, %v154_v40  ;;  %v166_v42 = vrot.slane %v154_v40, %v165_v39  ;;  %v518_v43 = vpop.f32.mrb[1].mxu0 }
 0x226   :  { %v173_v44 = vrot.slane %v159_v41, %v165_v39  ;;  %v174_v45 = vcombine.high %v166_v42, %v166_v42  ;;  %v182_v46 = vrot.slane %v166_v42, %v165_v39  ;;  %479 = vst.sshfl [vmem:[#allocation2] sm:$0x1 pattern:$0x73625140] %v166_v42 }
 0x227   :  { %v309_v47 = vpop.f32.mrb[0].mxu1 }
 0x228   :  { %v175_v48 = vcombine.high %v173_v44, %v173_v44  ;;  %v189_v49 = vrot.slane %v173_v44, %v165_v39  ;;  %v196_v50 = vrot.slane %v174_v45, %v165_v39  ;;  %v204_v51 = vcombine.high %v182_v46, %v182_v46  ;;  %480 = vst.sshfl [vmem:[#allocation2 + $0x2] sm:$0x1 pattern:$0x73625140] %v174_v45  ;;  %v529_v52 = vpop.f32.mrb[1].mxu1 }
 0x229   :  { %481 = vst.sshfl [vmem:[#allocation2 + $0x8] sm:$0x1 pattern:$0x73625140] %v173_v44  ;;  %v314_v53 = vcombine.high %v309_v47, %v309_v47  ;;  %v321_v54 = vrot.slane %v309_v47, %v165_v39 }
 0x22a   :  { %v203_v55 = vrot.slane %v175_v48, %v165_v39  ;;  %v205_v56 = vcombine.high %v189_v49, %v189_v49  ;;  %v206_v57 = vcombine.high %v196_v50, %v196_v50  ;;  %218 = vst [vmem:[#allocation2 + $0x4] sm:$0x1] %v204_v51  ;;  %482 = vst.sshfl [vmem:[#allocation2 + $0xa] sm:$0x1 pattern:$0x73625140] %v175_v48 }
 0x22b   :  { %v328_v58 = vrot.slane %v314_v53, %v165_v39  ;;  %v329_v59 = vcombine.high %v321_v54, %v321_v54  ;;  %v337_v60 = vrot.slane %v321_v54, %v165_v39  ;;  %493 = vst.sshfl [vmem:[#allocation2 + $0x1] sm:$0x1 pattern:$0x73625140] %v321_v54 }
 0x22c   :  { %v207_v61 = vcombine.high %v203_v55, %v203_v55  ;;  %219 = vst [vmem:[#allocation2 + $0x6] sm:$0x1] %v206_v57  ;;  %222 = vst [vmem:[#allocation2 + $0xc] sm:$0x1] %v205_v56 }
 0x22d   :  { %v330_v62 = vcombine.high %v328_v58, %v328_v58  ;;  %v344_v63 = vrot.slane %v328_v58, %v165_v39  ;;  %v351_v1 = vrot.slane %v329_v59, %v165_v39  ;;  %v359_v2 = vcombine.high %v337_v60, %v337_v60  ;;  %494 = vst.sshfl [vmem:[#allocation2 + $0x3] sm:$0x1 pattern:$0x73625140] %v329_v59 }
 0x22e   :  { %495 = vst.sshfl [vmem:[#allocation2 + $0x9] sm:$0x1 pattern:$0x73625140] %v328_v58  ;;  %223 = vst [vmem:[#allocation2 + $0xe] sm:$0x1] %v207_v61 }
 0x22f   :  { %v358_v3 = vrot.slane %v330_v62, %v165_v39  ;;  %v360_v4 = vcombine.high %v344_v63, %v344_v63  ;;  %v361_v5 = vcombine.high %v351_v1, %v351_v1  ;;  %373 = vst [vmem:[#allocation2 + $0x5] sm:$0x1] %v359_v2  ;;  %496 = vst.sshfl [vmem:[#allocation2 + $0xb] sm:$0x1 pattern:$0x73625140] %v330_v62 }
 0x231   :  { %v362_v6 = vcombine.high %v358_v3, %v358_v3  ;;  %374 = vst [vmem:[#allocation2 + $0x7] sm:$0x1] %v361_v5  ;;  %377 = vst [vmem:[#allocation2 + $0xd] sm:$0x1] %v360_v4 }
 0x232   :  { %v388_v7 = vld [vmem:[#allocation2] sm:$0x3] }
 0x233   :  { %378 = vst [vmem:[#allocation2 + $0xf] sm:$0x1] %v362_v6  ;;  %v389_v8 = vsel %vm387_vm0, %v388_v7, -1e+30  }
 0x234   :  { %v645_v9 = vmov %v389_v8  }
 0x235 LB: > { %s661_s12 = smov 1   ;;  %s662_s13 = smov 2   ;;  %v422_v30 = vstv %s651_s2  ;;  %s651_s2 = sphi %s735_s2, %s395_s2   ;;  %v647_v9 = vphi %v645_v9, %v646_v9  }
 0x236   : > { %400 = vrot.lane.b32.xlu0 %v647_v9, %s661_s12  ;;  %s497_s14 = sshll.u32 %s651_s2, 1  ;;  %vm423_vm3 = vcmp.lt.s32.totalorder %v422_v30, %v709_v0  ;;  %s395_s2 = sadd.s32 1, %s651_s2  }
 0x237   : > { %s398_s15 = scalar_lea.vmem [#allocation2], %s497_s14  ;;  %p392_p8 = scmp.ge.s32.totalorder %s395_s2, 8  }
 0x238   :  { %v426_v36 = vld [vmem:[%s769_s4] sm:$0x3] (%p392_p8)  ;;  %vm429_vm4 = vcmask (%p392_p8), 1041408   ;;  %s663_s18 = smov (%p392_p8), [#allocation6]  }
 0x239   :  { %vm427_vm5 = vcmp.gt.f32.partialorder (%p392_p8), %v426_v36, 0.0  ;;  %s450_s19 = sshll.u32 (%p392_p8), %s663_s18, 4  ;;  %s451_s19 = int_to_ptr.vmem [resolvable:$true] %s450_s19 }
 0x23a   : > { %403 = vrot.lane.b32.xlu0 %v647_v9, %s662_s13  ;;  %v399_v32 = vld [vmem:[%s398_s15] sm:$0x3]  ;;  %s611_s4 = scalar_lea.vmem (%p392_p8), %s451_s19, 32  ;;  %p616_p10 = scmp.lt.s32.totalorder (%p392_p8), %s451_s19, %s451_s19 }
 0x23b   :  { %p612_p9 = scmp.ne.s32.totalorder (%p392_p8), %s451_s19, %s611_s4  ;;  %p617_p11 = scmp.lt.s32.totalorder (%p392_p8), %s611_s4, %s611_s4 }
 0x23d   :  { %p618_p12 = por (%p392_p8), %p617_p11, %p616_p10 }
 0x23f   :  { %p619_p13 = pnand (%p392_p8), %p618_p12, %p612_p9 }
 0x2a8   : > { %v401_v10 = vpop.permute.xlu0 %400 }
 0x2a9   : > { %v402_v12 = vsel %vm383_vm15, %v401_v10, -1e+30 }
 0x2ac   : > { %v404_v11 = vpop.permute.xlu0 %403 }
 0x2ad   : > { %v405_v13 = vsel %vm728_vm2, %v404_v11, -1e+30 }
 0x2ae   : > { %v406_v14 = vmax.f32 %v402_v12, %v405_v13 }
 0x2b0   : > { %v407_v15 = vmax.f32 %v647_v9, %v406_v14 }
 0x2b2   : > { %v408_v16 = vsub.f32 %v647_v9, %v407_v15  ;;  %v411_v17 = vsub.f32 %v402_v12, %v407_v15  ;;  %v415_v18 = vsub.f32 %v405_v13, %v407_v15 }
 0x2b4   : > { %v409_v19 = vmul.f32 1.442695, %v408_v16  ;;  %v412_v20 = vmul.f32 1.442695, %v411_v17  ;;  %v416_v21 = vmul.f32 1.442695, %v415_v18 }
 0x2b6   : > { %577 = vpow2.f32 %v409_v19 }
 0x2b7   : > { %579 = vpow2.f32 %v412_v20 }
 0x2b8   : > { %581 = vpow2.f32 %v416_v21 }
 0x2c0   : > { %v578_v22 = vpop.eup %577 }
 0x2c1   : > { %v580_v23 = vpop.eup %579 }
 0x2c2   : > { %v414_v24 = vadd.f32 %v580_v23, %v578_v22  ;;  %v582_v26 = vpop.eup %581 }
 0x2c4   : > { %v418_v28 = vadd.f32 %v582_v26, %v414_v24 }
 0x2c6   : > { %583 = vlog2.f32 %v418_v28 }
 0x2d0   : > { %v584_v29 = vpop.eup %583 }
 0x2d1   : > { %v420_v31 = vmul.f32 0.6931472, %v584_v29 }
 0x2d2   :  { %394 = sbr.rel (!%p392_p8) target bundleno = 565 (0x235), region = 52 }
 0x2d3   : > { %v421_v33 = vadd.f32 %v420_v31, %v407_v15 }
 0x2d5   : > { %v424_v34 = vadd.f32 %v421_v33, %v399_v32 }
 0x2d7   : > { %v425_v35 = vsel %vm423_vm3, %v424_v34, %v647_v9  }
 0x2d8   : > { %v646_v9 = vmov %v425_v35   ;;  %v428_v37 = vsel (%p392_p8), %vm427_vm5, %v425_v35, -1e+30 }
 0x2d9   :  { %v430_v38 = vsel %vm429_vm4, %v428_v37, -inf }
 0x2da   :  { %431 = vmax.xlane.f32.xlu0 %v430_v38 }
 0x367   :  { %v432_v39 = vpop.xlane.xlu0 %431 }
 0x368   :  { %v433_v40 = vsub.f32 %v428_v37, %v432_v39 }
 0x36a   :  { %v434_v41 = vmul.f32 1.442695, %v433_v40 }
 0x36c   :  { %585 = vpow2.f32 %v434_v41 }
 0x376   :  { %v586_v42 = vpop.eup %585 }
 0x377   :  { %v436_v43 = vsel %vm429_vm4, %v586_v42, 0.0 }
 0x378   :  { %437 = vadd.xlane.f32.xlu0 %v436_v43 }
 0x405   :  { %v438_v44 = vpop.xlane.xlu0 %437 }
 0x406   :  { %587 = vlog2.f32 %v438_v44 }
 0x410   :  { %v588_v45 = vpop.eup %587 }
 0x411   :  { %v440_v46 = vmul.f32 0.6931472, %v588_v45 }
 0x413   :  { %v441_v0 = vadd.f32 %v440_v46, %v432_v39 }
 0x415   :  { %v442_v25 = vsub.f32 0.0, %v441_v0 }
 0x417   :  { %443 = vst [vmem:[#allocation6] sm:$0x3] %v442_v25 }
 0x418   :  { %622 = shalt.err (!%p619_p13)
}
 0x419   :  { %s623_s22 = scalar_lea.hbm %s770_s5, 32 }
 0x41a   :  { %p624_p0 = scmp.ne.s32.totalorder %s770_s5, %s623_s22  ;;  %p627_p1 = scmp.lt.u32.totalorder %s623_s22, %s770_s5 }
 0x41c   :  { %p629_p2 = pnand %p627_p1, %p624_p0 }
 0x41e   :  { %632 = shalt.err (!%p629_p2)
}
 0x41f   :  { %453 = dma.vmem_to_hbm [thread:$0]  %s451_s19, 32, %s770_s5, [#allocation5]  }
 0x420   :  { %643 = dma.done.wait [#allocation5], 32  }
 0x421   :  { %644 = vsyncadd [#allocation5], 4294967264 }
 0x422   :  { %457 = vsyncpa [#allocation4], 1 }
 0x423   :  { %458 = vsyncpa [#allocation5], 1 }

</bundles_post_ra>
